<compile_context>
chip_gen: v7x
topology: tpu7x:2x2x1
jax: 0.10.0
libtpu: 0.0.40
codegen_flags: <defaults>
</compile_context>

<pallas_src>
import functools

import jax
import jax.numpy as jnp
from jax.experimental import pallas as pl
from jax.experimental.pallas import tpu as pltpu


def stam_kernel(x_ref, wsp_ref, bsp_ref, w1_ref, w2_ref, o_ref, *, hw, padded):
    # x_ref block: (B, C, S) f32; weights are full arrays resident in VMEM/SMEM.
    wsp = wsp_ref[...]                              # (1, C)  spatial 1x1 conv weight
    b_sp = bsp_ref[0, 0]                            # scalar bias of that conv
    w1 = w1_ref[...]                                # (Cr, C) shared MLP conv1 (no bias)
    w2 = w2_ref[...]                                # (C, Cr) shared MLP conv2 (no bias)

    B = x_ref.shape[0]
    inv_hw = 1.0 / hw

    # Static unroll over the images in this block (B is small); each iteration
    # is fully independent, ends in its own o_ref[b] store, and keeps x_sp as a
    # value so there is no store->load ordering barrier inside an image.
    for b in range(B):
        xb = x_ref[b]                               # (C, S)

        # --- spatial attention: sigmoid(conv1x1(x)); lane-dense (1, S) result ---
        s = jnp.dot(wsp, xb, preferred_element_type=jnp.float32) + b_sp
        x_sp = xb * jax.nn.sigmoid(s)               # (C, S), kept as a value

        # --- channel pooling over spatial positions, both on the live value ---
        avg = jnp.sum(x_sp, axis=1, keepdims=True) * inv_hw        # (C, 1)
        if padded:
            # padded lanes hold 0 (padded x is 0), so the sum is unaffected but
            # the max must exclude them.
            lane = jax.lax.broadcasted_iota(jnp.int32, x_sp.shape, 1)
            mx = jnp.max(jnp.where(lane < hw, x_sp, -jnp.inf),
                         axis=1, keepdims=True)                     # (C, 1)
        else:
            mx = jnp.max(x_sp, axis=1, keepdims=True)               # (C, 1)

        # Stack [avg | max] into one (C, 2) tile so the shared MLP runs once for
        # both pooled vectors (select-on-lane-index avoids a lane-concat).
        col = jax.lax.broadcasted_iota(jnp.int32, (x_sp.shape[0], 2), 1)
        pooled = jnp.where(col == 0, avg, mx)                       # (C, 2)

        # --- shared MLP: Conv1x1(C->C/r, no bias), ReLU, Conv1x1(C/r->C) ---
        h = jnp.maximum(
            jnp.dot(w1, pooled, preferred_element_type=jnp.float32), 0.0)  # (Cr, 2)
        y = jnp.dot(w2, h, preferred_element_type=jnp.float32)             # (C, 2)

        # avg_out + max_out == row-sum of y; sigmoid -> channel attention (C, 1)
        channel_att = jax.nn.sigmoid(jnp.sum(y, axis=1, keepdims=True))

        # --- single store per image ---
        o_ref[b] = (x_sp * channel_att).astype(o_ref.dtype)


def _pick_block_batch(n, per_image_bytes, target_bytes=4 << 20):
    """Largest divisor of n with block <= target bytes, keeping >=2 grid steps."""
    max_b = max(1, min(n, target_bytes // max(per_image_bytes, 1)))
    if n >= 2:
        # Keep at least two grid steps so v7x's two TensorCores both get work.
        max_b = min(max_b, n // 2)
    max_b = max(1, max_b)
    best = 1
    for d in range(1, max_b + 1):
        if n % d == 0:
            best = d
    return best


def stam_block(x_nchw, w_sp, b_sp, w1, w2):
    """STAMBlock forward.

    x_nchw: (N, C, H, W) float32
    w_sp:   (1, C)  weight of the spatial-pool 1x1 conv (out=1)
    b_sp:   (1, 1)  bias of that conv
    w1:     (Cr, C) first MLP 1x1 conv weight (no bias)
    w2:     (C, Cr) second MLP 1x1 conv weight (no bias)
    """
    N, C, H, W = x_nchw.shape
    HW = H * W
    Cr = w1.shape[0]

    # Pure reshape of NCHW (channels stay the second dim, HW flattened last),
    # then pad HW up to a multiple of 128 for lane-dense stores.
    S = ((HW + 127) // 128) * 128
    x = x_nchw.reshape(N, C, HW)
    if S != HW:
        x = jnp.pad(x, ((0, 0), (0, 0), (0, S - HW)))

    per_image_bytes = C * S * 4
    B = _pick_block_batch(N, per_image_bytes)
    grid = (N // B,)

    # Generation-aware VMEM budget (v5e/v6e: 128 MiB, v7x: 64 MiB physical).
    try:
        vmem_cap = pltpu.get_tpu_info().vmem_capacity_bytes
    except Exception:
        vmem_cap = 64 << 20
    usable = max(32 << 20, vmem_cap - (16 << 20))     # leave runtime headroom
    weight_bytes = (2 * Cr * C + C + 1) * 4
    need = 4 * B * per_image_bytes + 2 * weight_bytes + (4 << 20)
    vmem_limit = int(min(max(need, 32 << 20), usable))
    # TODO(synk): for a single image whose C*S block exceeds the v7x VMEM budget
    # (e.g. C=512, HW=8192), add an HW-tiled 'arbitrary' grid axis with -inf/0
    # initialized pooling accumulators and a cheap second pass for the
    # channel-attention multiply; at these shapes a full (C, S) block suffices.
    # TODO(synk): constant-index weight specs could use pipeline_mode=pl.Buffered(1)
    # to drop their second buffer; skipped here — negligible at these sizes.

    kernel = functools.partial(stam_kernel, hw=HW, padded=(S != HW))

    out = pl.pallas_call(
        kernel,
        out_shape=jax.ShapeDtypeStruct((N, C, S), jnp.float32),
        grid_spec=pltpu.PrefetchScalarGridSpec(
            num_scalar_prefetch=0,
            grid=grid,
            in_specs=[
                pl.BlockSpec((B, C, S), lambda n: (n, 0, 0)),
                pl.BlockSpec((1, C), lambda n: (0, 0)),
                pl.BlockSpec(memory_space=pltpu.MemorySpace.SMEM),
                pl.BlockSpec((Cr, C), lambda n: (0, 0)),
                pl.BlockSpec((C, Cr), lambda n: (0, 0)),
            ],
            out_specs=pl.BlockSpec((B, C, S), lambda n: (n, 0, 0)),
        ),
        compiler_params=pltpu.CompilerParams(
            dimension_semantics=("parallel",),
            vmem_limit_bytes=vmem_limit,
        ),
    )(x, w_sp, b_sp, w1, w2)

    if S != HW:
        out = out[:, :, :HW]
    # Pure reshape back to NCHW.
    return out.reshape(N, C, H, W)


def stam_reference(x_nchw, w_sp, b_sp, w1, w2):
    """Pure-JAX reference matching the PyTorch forward (NCHW)."""
    s = jnp.einsum("nchw,oc->nohw", x_nchw, w_sp) + b_sp[0, 0]
    spatial_att = jax.nn.sigmoid(s)                           # (N,1,H,W)
    x_sp = x_nchw * spatial_att                               # (N,C,H,W)
    avg = jnp.mean(x_sp, axis=(2, 3))                         # (N,C)
    mx = jnp.max(x_sp, axis=(2, 3))                           # (N,C)

    def mlp(v):                                               # (N,C)
        h = jnp.maximum(v @ w1.T, 0.0)                        # (N,Cr)
        return h @ w2.T                                       # (N,C)

    ch = jax.nn.sigmoid(mlp(avg) + mlp(mx))                   # (N,C)
    return x_sp * ch[:, :, None, None]


if __name__ == "__main__":
    N, C, H, W = 2, 16, 16, 16
    reduction = 8
    Cr = C // reduction

    key = jax.random.PRNGKey(0)
    kx, k1, k2, k3, k4 = jax.random.split(key, 5)

    x = jax.random.normal(kx, (N, C, H, W), dtype=jnp.float32)
    # deterministic synthetic parameters (1x1 conv weights as 2-D matrices)
    w_sp = jax.random.normal(k1, (1, C), dtype=jnp.float32) * 0.1   # spatial conv weight
    b_sp = jax.random.normal(k2, (1, 1), dtype=jnp.float32) * 0.1   # spatial conv bias
    w1 = jax.random.normal(k3, (Cr, C), dtype=jnp.float32) * 0.1    # mlp conv1 (no bias)
    w2 = jax.random.normal(k4, (C, Cr), dtype=jnp.float32) * 0.1    # mlp conv2 (no bias)

    out = stam_block(x, w_sp, b_sp, w1, w2)
    out = jax.block_until_ready(out)

    ref = stam_reference(x, w_sp, b_sp, w1, w2)
    assert out.shape == (N, C, H, W)
    assert jnp.allclose(out, ref, atol=1e-5, rtol=1e-5), "mismatch vs reference"

    print("KERNEL_OK")
</pallas_src>

<mosaic_0001>
module attributes {stable_mosaic.version = 11 : i64} {
  func.func @stam_kernel(%arg0: i32, %arg1: memref<1x16x256xf32, #tpu.memory_space<vmem>>, %arg2: memref<1x16xf32, #tpu.memory_space<vmem>>, %arg3: memref<1x1xf32, #tpu.memory_space<smem>>, %arg4: memref<2x16xf32, #tpu.memory_space<vmem>>, %arg5: memref<16x2xf32, #tpu.memory_space<vmem>>, %arg6: memref<1x16x256xf32, #tpu.memory_space<vmem>>) attributes {dimension_semantics = [#tpu.dimension_semantics<parallel>], iteration_bounds = array<i64: 2>, scalar_prefetch = 0 : i64, scratch_operands = 0 : i64, tpu.core_type = #tpu.core_type<tc>, window_params = [{transform_indices = @transform_0, window_bounds = array<i64: 1, 16, 256>}, {pipeline_mode = #tpu.pipeline_mode<synchronous>, transform_indices = @transform_1, window_bounds = array<i64: 1, 16>}, {transform_indices = @transform_2, window_bounds = array<i64: 1, 1>}, {pipeline_mode = #tpu.pipeline_mode<synchronous>, transform_indices = @transform_3, window_bounds = array<i64: 2, 16>}, {pipeline_mode = #tpu.pipeline_mode<synchronous>, transform_indices = @transform_4, window_bounds = array<i64: 16, 2>}, {transform_indices = @transform_5, window_bounds = array<i64: 1, 16, 256>}]} {
    %c0 = arith.constant 0 : index
    %c0_0 = arith.constant 0 : index
    %0 = vector.load %arg2[%c0, %c0_0] : memref<1x16xf32, #tpu.memory_space<vmem>>, vector<1x16xf32>
    %c0_1 = arith.constant 0 : index
    %c0_2 = arith.constant 0 : index
    %1 = memref.load %arg3[%c0_1, %c0_2] : memref<1x1xf32, #tpu.memory_space<smem>>
    %c0_3 = arith.constant 0 : index
    %c0_4 = arith.constant 0 : index
    %2 = vector.load %arg4[%c0_3, %c0_4] : memref<2x16xf32, #tpu.memory_space<vmem>>, vector<2x16xf32>
    %c0_5 = arith.constant 0 : index
    %c0_6 = arith.constant 0 : index
    %3 = vector.load %arg5[%c0_5, %c0_6] : memref<16x2xf32, #tpu.memory_space<vmem>>, vector<16x2xf32>
    %c0_7 = arith.constant 0 : index
    %c0_8 = arith.constant 0 : index
    %c0_9 = arith.constant 0 : index
    %4 = vector.load %arg1[%c0_7, %c0_8, %c0_9] : memref<1x16x256xf32, #tpu.memory_space<vmem>>, vector<1x16x256xf32>
    %5 = vector.shape_cast %4 : vector<1x16x256xf32> to vector<16x256xf32>
    %cst = arith.constant dense<0.000000e+00> : vector<1x256xf32>
    %6 = tpu.matmul %0, %5, %cst {dimension_numbers = #tpu.dot_dimension_numbers<[1], [0], [0], [1], [0, 0, 1, 1], [], []>} : vector<1x16xf32>, vector<16x256xf32>, vector<1x256xf32> -> vector<1x256xf32>
    %7 = vector.broadcast %1 : f32 to vector<1x256xf32>
    %8 = arith.addf %6, %7 : vector<1x256xf32>
    %9 = arith.negf %8 : vector<1x256xf32>
    %10 = math.exp %9 : vector<1x256xf32>
    %cst_10 = arith.constant 1.000000e+00 : f32
    %11 = vector.broadcast %cst_10 : f32 to vector<1x256xf32>
    %12 = arith.addf %11, %10 : vector<1x256xf32>
    %13 = arith.divf %11, %12 : vector<1x256xf32>
    %14 = vector.broadcast %13 : vector<1x256xf32> to vector<16x256xf32>
    %15 = arith.mulf %5, %14 : vector<16x256xf32>
    %cst_11 = arith.constant dense<0.000000e+00> : vector<16xf32>
    %16 = vector.multi_reduction <add>, %15, %cst_11 [1] : vector<16x256xf32> to vector<16xf32>
    %17 = vector.shape_cast %16 : vector<16xf32> to vector<16x1xf32>
    %cst_12 = arith.constant 3.906250e-03 : f32
    %18 = vector.broadcast %cst_12 : f32 to vector<16x1xf32>
    %19 = arith.mulf %17, %18 : vector<16x1xf32>
    %cst_13 = arith.constant dense<0xFF800000> : vector<16xf32>
    %20 = vector.multi_reduction <maximumf>, %15, %cst_13 [1] : vector<16x256xf32> to vector<16xf32>
    %21 = vector.shape_cast %20 : vector<16xf32> to vector<16x1xf32>
    %22 = tpu.iota {dimensions = array<i32: 1>} : vector<16x2xi32>
    %c0_i32 = arith.constant 0 : i32
    %23 = vector.broadcast %c0_i32 : i32 to vector<16x2xi32>
    %24 = arith.cmpi eq, %22, %23 : vector<16x2xi32>
    %25 = vector.shape_cast %19 : vector<16x1xf32> to vector<16x1xf32>
    %26 = vector.broadcast %25 : vector<16x1xf32> to vector<16x2xf32>
    %27 = vector.shape_cast %21 : vector<16x1xf32> to vector<16x1xf32>
    %28 = vector.broadcast %27 : vector<16x1xf32> to vector<16x2xf32>
    %29 = arith.select %24, %26, %28 : vector<16x2xi1>, vector<16x2xf32>
    %cst_14 = arith.constant dense<0.000000e+00> : vector<2x2xf32>
    %30 = tpu.matmul %2, %29, %cst_14 {dimension_numbers = #tpu.dot_dimension_numbers<[1], [0], [0], [1], [0, 0, 1, 1], [], []>} : vector<2x16xf32>, vector<16x2xf32>, vector<2x2xf32> -> vector<2x2xf32>
    %cst_15 = arith.constant 0.000000e+00 : f32
    %31 = vector.broadcast %cst_15 : f32 to vector<2x2xf32>
    %32 = arith.maximumf %30, %31 : vector<2x2xf32>
    %cst_16 = arith.constant dense<0.000000e+00> : vector<16x2xf32>
    %33 = tpu.matmul %3, %32, %cst_16 {dimension_numbers = #tpu.dot_dimension_numbers<[1], [0], [0], [1], [0, 0, 1, 1], [], []>} : vector<16x2xf32>, vector<2x2xf32>, vector<16x2xf32> -> vector<16x2xf32>
    %cst_17 = arith.constant dense<0.000000e+00> : vector<16xf32>
    %34 = vector.multi_reduction <add>, %33, %cst_17 [1] : vector<16x2xf32> to vector<16xf32>
    %35 = vector.shape_cast %34 : vector<16xf32> to vector<16x1xf32>
    %36 = arith.negf %35 : vector<16x1xf32>
    %37 = math.exp %36 : vector<16x1xf32>
    %cst_18 = arith.constant 1.000000e+00 : f32
    %38 = vector.broadcast %cst_18 : f32 to vector<16x1xf32>
    %39 = arith.addf %38, %37 : vector<16x1xf32>
    %40 = arith.divf %38, %39 : vector<16x1xf32>
    %41 = vector.broadcast %40 : vector<16x1xf32> to vector<16x256xf32>
    %42 = arith.mulf %15, %41 : vector<16x256xf32>
    %c0_19 = arith.constant 0 : index
    %c0_20 = arith.constant 0 : index
    %c0_21 = arith.constant 0 : index
    %43 = vector.load %arg6[%c0_19, %c0_20, %c0_21] : memref<1x16x256xf32, #tpu.memory_space<vmem>>, vector<1x16x256xf32>
    %44 = vector.shape_cast %43 : vector<1x16x256xf32> to vector<16x256xf32>
    %45 = vector.shape_cast %42 : vector<16x256xf32> to vector<1x16x256xf32>
    tpu.vector_store %arg6[%c0_19, %c0_20, %c0_21], %45 {strides = array<i32>} : memref<1x16x256xf32, #tpu.memory_space<vmem>>, vector<1x16x256xf32>,
    return
  }
  func.func @transform_0(%arg0: i32) -> (i32, i32, i32) {
    %c0_i32 = arith.constant 0 : i32
    %c0_i32_0 = arith.constant 0 : i32
    %c0_i32_1 = arith.constant 0 : i32
    return %arg0, %c0_i32, %c0_i32_0 : i32, i32, i32
  }
  func.func @transform_1(%arg0: i32) -> (i32, i32) {
    %c0_i32 = arith.constant 0 : i32
    %c0_i32_0 = arith.constant 0 : i32
    %c0_i32_1 = arith.constant 0 : i32
    return %c0_i32, %c0_i32_0 : i32, i32
  }
  func.func @transform_2(%arg0: i32) -> (i32, i32) {
    %c0_i32 = arith.constant 0 : i32
    %c0_i32_0 = arith.constant 0 : i32
    %c0_i32_1 = arith.constant 0 : i32
    return %c0_i32, %c0_i32_0 : i32, i32
  }
  func.func @transform_3(%arg0: i32) -> (i32, i32) {
    %c0_i32 = arith.constant 0 : i32
    %c0_i32_0 = arith.constant 0 : i32
    %c0_i32_1 = arith.constant 0 : i32
    return %c0_i32, %c0_i32_0 : i32, i32
  }
  func.func @transform_4(%arg0: i32) -> (i32, i32) {
    %c0_i32 = arith.constant 0 : i32
    %c0_i32_0 = arith.constant 0 : i32
    %c0_i32_1 = arith.constant 0 : i32
    return %c0_i32, %c0_i32_0 : i32, i32
  }
  func.func @transform_5(%arg0: i32) -> (i32, i32, i32) {
    %c0_i32 = arith.constant 0 : i32
    %c0_i32_0 = arith.constant 0 : i32
    %c0_i32_1 = arith.constant 0 : i32
    return %arg0, %c0_i32, %c0_i32_0 : i32, i32, i32
  }
}

</mosaic_0001>

<bundles_post_ra>
// kernel: tpu_custom_call.1
= control target key start
LH: loop header
LB: loop body
LE: loop exit
PB: predicated region body
PF: predicated region fallthrough
CT: control target
= control target key end

     0   :  { %s1094_s0 = inlined_call_operand.hbm [shape: f32[2,16,256], index: 0, kind: input, shape index: {}]   ;;  %s1095_s1 = inlined_call_operand.vmem [shape: f32[1,16], index: 1, kind: input, shape index: {}]   ;;  %s1096_s2 = inlined_call_operand.<no memory space> [shape: f32[1,1], index: 2, kind: input, shape index: {}]   ;;  %s1097_s3 = inlined_call_operand.vmem [shape: f32[2,16], index: 3, kind: input, shape index: {}]   ;;  %s1098_s4 = inlined_call_operand.vmem [shape: f32[16,2], index: 4, kind: input, shape index: {}]   ;;  %s1099_s5 = inlined_call_operand.hbm [shape: f32[2,16,256], index: 5, kind: output, shape index: {}]  }
   0x1   :  { %10 = sst [smem:[#allocation2]] %s1096_s2 }
   0x2   :  { %11 = vsyncpa [#allocation4], 0 }
   0x3   :  { %13 = vsyncpa [#allocation4 + $0x1], 0 }
   0x4   :  { %14 = vsyncpa [#allocation5], 0 }
   0x5   :  { %16 = vsyncpa [#allocation5 + $0x1], 0  ;;  %s904_s20 = smov 0   ;;  %s906_s21 = smov 0  }
   0x6   :  { %s908_s22 = smov 0   ;;  %s910_s23 = smov 0  }
   0x7 LB: > { %s925_s2 = sadd.s32 4294967295, %s860_s23   ;;  %s645_s24 = sadd.s32 4294967294, %s860_s23   ;;  %s860_s23 = sphi %s910_s23, %s1112_s23   ;;  %s856_s22 = sphi %s908_s22, %s1111_s22   ;;  %s852_s21 = sphi %s906_s21, %s1110_s21   ;;  %s848_s20 = sphi %s904_s20, %s1109_s20  }
   0x8   : > { %s929_s25 = sadd.s32 1, %s860_s23   ;;  %s29_s26 = sadd.s32 1, %s856_s22 }
   0x9   : > { %s26_s27 = ssub.s32 %s860_s23, %s929_s25  ;;  %p36_p0 = scmp.ne.s32.totalorder %s856_s22, %s852_s21 }
   0xa   : > { %p27_p1 = scmp.eq.s32.totalorder %s26_s27, 0  ;;  %p37_p2 = scmp.eq.s32.totalorder %s860_s23, 0 }
   0xb   : > { %p42_p3 = scmp.ne.s32.totalorder %s852_s21, %s848_s20  ;;  %p43_p4 = scmp.eq.s32.totalorder %s925_s2, 0 }
   0xc   : > { %s941_s28 = scalar_select %p27_p1, %s856_s22, %s29_s26  }
   0xd   : > { %p943_p5 = por %p37_p2, %p36_p0  ;;  %p947_p6 = por %p43_p4, %p42_p3 }
   0xe   : > { %p150_p7 = scmp.eq.s32.totalorder %s925_s2, 1  ;;  %p156_p8 = scmp.eq.s32.totalorder %s645_s24, 1 }
   0xf   : > { %p707_p10 = scmp.lt.s32.totalorder %s860_s23, 2  ;;  %s188_s8 = sand.u32 1, %s856_s22  }
  0x10   : > { %p954_p11 = por %p150_p7, %p36_p0  ;;  %p958_p12 = por %p156_p8, %p42_p3 }
  0x11   : > { %s668_s9 = sshll.u32 %s860_s23, 9  ;;  %s648_s10 = sshll.u32 %s188_s8, 5 }
  0x12   : > { %s1103_s6 = scalar_select %p954_p11, 1, 0 }
  0x13   : > { %s1104_s7 = scalar_select %p958_p12, 1, 0 }
  0x14   : > { %s967_s13 = scalar_lea.hbm %s1094_s0, %s668_s9  ;;  %s192_s14 = scalar_lea.vmem [#allocation3], %s648_s10 }
  0x15   : > { %s199_s15 = sshll.u32 %s192_s14, 4  ;;  %p971_p13 = pnand %p707_p10, %p943_p5  ;;  %s975_s15 = int_to_ptr.vmem [resolvable:$true] %s199_s15 }
  0x16   : > { %s977_s17 = scalar_lea.sflag [#allocation4], %s188_s8  ;;  %s764_s18 = scalar_lea.hbm %s967_s13, 512 }
  0x17   : > { %p765_p0 = scmp.ne.s32.totalorder %s967_s13, %s764_s18  ;;  %p766_p1 = pneg %p971_p13 }
  0x18   : > { %s769_s26 = scalar_lea.hbm %s1094_s0, 1024  ;;  %p770_p4 = scmp.lt.u32.totalorder %s967_s13, %s1094_s0 }
  0x19   : > { %p767_p2 = pnand %p766_p1, %p765_p0  ;;  %p771_p5 = scmp.lt.u32.totalorder %s769_s26, %s764_s18 }
  0x1a   : > { %p773_p8 = scmp.lt.u32.totalorder %s764_s18, %s967_s13 }
  0x1b   : > { %p768_p3 = pneg %p767_p2  ;;  %p772_p7 = por %p771_p5, %p770_p4 }
  0x1d   : > { %p774_p10 = por %p773_p8, %p772_p7 }
  0x1f   : > { %p775_p9 = pnand %p774_p10, %p768_p3 }
  0x21   : > { %778 = shalt.err (!%p775_p9)
}
  0x22   : > { %s779_s8 = scalar_lea.vmem %s975_s15, 512  ;;  %s862_s9 = smov [#allocation3]  }
  0x23   : > { %p780_p0 = scmp.ne.s32.totalorder %s975_s15, %s779_s8  ;;  %s784_s10 = sshll.u32 %s862_s9, 4  ;;  %s785_s10 = int_to_ptr.vmem [resolvable:$false] %s784_s10 }
  0x24   : > { %s786_s11 = scalar_lea.vmem %s785_s10, 1024  ;;  %p787_p11 = scmp.lt.s32.totalorder %s975_s15, %s785_s10 }
  0x25   : > { %p782_p2 = pnand %p780_p0, %p766_p1  ;;  %p788_p4 = scmp.lt.s32.totalorder %s786_s11, %s779_s8 }
  0x27   : > { %p783_p12 = pneg %p782_p2  ;;  %p789_p5 = por %p788_p4, %p787_p11 }
  0x29   : > { %p790_p7 = pnand %p789_p5, %p783_p12 }
  0x2b   : > { %793 = shalt.err (!%p790_p7)
}
  0x2c   : > { %s863_s12 = smov 256   ;;  %s864_s14 = smov 16  }
  0x2d   : > { %702 = dma.hbm_to_vmem [thread:$0]  (!%p971_p13), %s967_s13, 512, %s975_s15, %s977_s17, %s863_s12, %s863_s12, %s864_s14  }
  0x2e   : > { %p651_p9 = scmp.ge.s32.totalorder %s860_s23, 1  ;;  %p207_p1 = scmp.lt.s32.totalorder %s860_s23, 3 }
  0x30   : > { %p208_p3 = pnand %p651_p9, %p207_p1 }
  0x31   : > { %s1008_s18 = sand.u32 (!%p208_p3), 1, %s852_s21  }
  0x32   : > { %211 = sbr.rel (%p208_p3) target bundleno = 1081 (0x439), region = 40  ;;  %s652_s19 = sshll.u32 (!%p208_p3), %s1008_s18, 5 }
  0x33   : > { %s214_s24 = scalar_lea.sflag (!%p208_p3), [#allocation4], %s1008_s18  ;;  %s217_s26 = scalar_lea.vmem (!%p208_p3), [#allocation3], %s652_s19 }
  0x39   : > { %839 = dma.done.wait (%p947_p6), %s214_s24, 512  }
  0x3a   : > { %841 = vsyncadd (%p947_p6), %s214_s24, 4294966784  ;;  %v865_v0 = vmov 0.0   ;;  %v250_v1 = vld [vmem:[%s217_s26 + $0x8] sm:$0xff]  ;;  %v252_v2 = vld [vmem:[%s217_s26 + $0x18] sm:$0xff]  ;;  %vm254_vm0 = vcmask 130048   ;;  %s245_s16 = sld [smem:[#allocation2]]  ;;  %v341_v19 = vlaneseq }
  0x3b   : > { %322 = vmatprep.mubr.f32.mxu0 %v865_v0  ;;  %v249_v3 = vld [vmem:[%s217_s26] sm:$0xff]  ;;  %v688_v4 = vpack.c.bf16 %v252_v2, %v250_v1  ;;  %v251_v5 = vld [vmem:[%s217_s26 + $0x10] sm:$0xff]  ;;  %v866_v34 = vmov 0.0|0.0   ;;  %vm867_vm1 = vmmov 0   ;;  %vm446_vm3 = vcmask 15360   ;;  %v248_v50 = vld [vmem:[%s1098_s4 + $0x8] sm:$0xff] }
  0x3c   : > { %v690_v6 = vpack.c.bf16 %v251_v5, %v249_v3  ;;  %v244_v7 = vld [vmem:[%s1095_s1] sm:$0x1]  ;;  %v342_v20 = vshrl.u32 %v341_v19, 7  ;;  %692 = vmatprep.subr.bf16.mxu1 %v866_v34  ;;  %680 = vmatprep.mubr.msk.f32.mxu1 %vm867_vm1, %v865_v0  ;;  %v368_v37 = vand.u32 127, %v341_v19  ;;  %vm453_vm4 = vcmask 1041408   ;;  %s669_s10 = sshll.u32 %s925_s2, 9 }
  0x3d   : > { %689 = vmatprep.subr.bf16.mxu0 %v688_v4  ;;  %v246_v45 = vld [vmem:[%s1097_s3] sm:$0x3]  ;;  %s243_s11 = scalar_lea.vmem [#allocation6], %s652_s19  ;;  %s1046_s26 = scalar_lea.hbm %s1099_s5, %s669_s10 }
  0x3e   : > { %691 = vmatpush1.bf16.msra.mxu0 %v690_v6  ;;  %v343_v21 = vsub.s32 0, %v342_v20  ;;  %vm369_vm2 = vcmp.eq.s32.totalorder %v368_v37, 0  ;;  %v247_v46 = vld [vmem:[%s1098_s4] sm:$0xff]  ;;  %s572_s12 = sshll.u32 %s243_s11, 4  ;;  %s559_s2 = scalar_lea.sflag [#allocation5], %s1008_s18  ;;  %s1048_s12 = int_to_ptr.vmem [resolvable:$true] %s572_s12 }
  0x3f   : > { %s794_s19 = scalar_lea.vmem %s1048_s12, 512  ;;  %p1106_p11 = scmp.ne.s32.totalorder %s1103_s6, 0 }
  0x40   : > { %v253_v8 = vstv %s245_s16  ;;  %p795_p6 = scmp.ne.s32.totalorder %s1048_s12, %s794_s19  ;;  %s868_s13 = smov [#allocation6]  }
  0x41   : > { %654 = vmatmul.mubr.msk.f32.vlgmr.msra.gmra.mrb[0].mxu0 %vm254_vm0, %v244_v7  ;;  %s798_s15 = sshll.u32 %s868_s13, 4  ;;  %s799_s15 = int_to_ptr.vmem [resolvable:$false] %s798_s15 }
  0x42   : > { %685 = vmatprep.mubr.msk.f32.mxu0 %vm446_vm3, %v247_v46  ;;  %p796_p12 = pnand %p795_p6, %p1106_p11  ;;  %s800_s16 = scalar_lea.vmem %s799_s15, 1024 }
  0x43   : > { %p801_p8 = scmp.lt.s32.totalorder %s1048_s12, %s799_s15  ;;  %p802_p10 = scmp.lt.s32.totalorder %s800_s16, %s794_s19 }
  0x44   : > { %p797_p13 = pneg %p796_p12 }
  0x45   : > { %p803_p0 = por %p802_p10, %p801_p8 }
  0x47   : > { %p804_p2 = pnand %p803_p0, %p797_p13 }
 0x114   : > { %v324_v9 = vpop.f32.mrb[0].mxu0 }
 0x115   : > { %v325_v10 = vadd.f32 %v324_v9, %v253_v8  ;;  %v326_v11 = vpop.f32.mrb[1].mxu0 }
 0x116   : > { %v327_v12 = vadd.f32 %v326_v11, %v253_v8 }
 0x117   : > { %v655_v13 = vmul.f32 -1.442695, %v325_v10 }
 0x118   : > { %v656_v14 = vmul.f32 -1.442695, %v327_v12 }
 0x119   : > { %748 = vpow2.f32 %v655_v13 }
 0x11a   : > { %750 = vpow2.f32 %v656_v14 }
 0x123   : > { %v749_v15 = vpop.eup %748 }
 0x124   : > { %v751_v16 = vpop.eup %750  ;;  %v335_v17 = vadd.f32 1.0, %v749_v15 }
 0x125   : > { %v336_v18 = vadd.f32 1.0, %v751_v16 }
 0x126   : > { %752 = vrcp.f32 %v335_v17 }
 0x127   : > { %754 = vrcp.f32 %v336_v18 }
 0x130   : > { %v753_v22 = vpop.eup %752 }
 0x131   : > { %v755_v23 = vpop.eup %754  ;;  %v344_v24 = vrot.slane %v753_v22, %v343_v21 }
 0x132   : > { %v348_v25 = vrot.slane %v755_v23, %v343_v21 }
 0x133   : > { %v1022_v26 = vmul.f32 %v344_v24, %v249_v3  ;;  %v351_v30 = vmul.f32 %v344_v24, %v251_v5 }
 0x134   : > { %v1024_v27 = vmul.f32 %v348_v25, %v250_v1  ;;  %v352_v31 = vmul.f32 %v348_v25, %v252_v2 }
 0x136   : > { %v361_v28 = vmax.f32 %v1022_v26, %v1024_v27  ;;  %v353_v29 = vadd.f32 %v1024_v27, %v1022_v26  ;;  %v364_v32 = vmax.f32 %v351_v30, %v352_v31  ;;  %v356_v33 = vadd.f32 %v352_v31, %v351_v30 }
 0x138   : > { %362 = vmax.xlane.f32.xlu1 %v361_v28  ;;  %354 = vadd.xlane.f32.xlu0 %v353_v29 }
 0x13c   : > { %365 = vmax.xlane.f32.xlu1 %v364_v32  ;;  %357 = vadd.xlane.f32.xlu0 %v356_v33 }
 0x1c5   : > { %v363_v35 = vpop.xlane.xlu1 %362  ;;  %v355_v36 = vpop.xlane.xlu0 %354 }
 0x1c6   : > { %v359_v38 = vmul.f32 0.00390625, %v355_v36 }
 0x1c8   : > { %v370_v42 = vsel %vm369_vm2, %v359_v38, %v363_v35 }
 0x1c9   : > { %v358_v39 = vpop.xlane.xlu0 %357  ;;  %v366_v41 = vpop.xlane.xlu1 %365 }
 0x1ca   : > { %v360_v40 = vmul.f32 0.00390625, %v358_v39 }
 0x1cc   : > { %v371_v43 = vsel %vm369_vm2, %v360_v40, %v366_v41 }
 0x1cd   : > { %v693_v44 = vpack.c.bf16 %v371_v43, %v370_v42 }
 0x1cf   : > { %694 = vmatpush3.bf16.msra.mxu1 %v693_v44 }
 0x1d2   : > { %681 = vmatmul.mubr.msk.f32.vlgmr.msra.gmra.mrb[0].mxu1 %vm254_vm0, %v246_v45 }
 0x2a5   : > { %v441_v47 = vpop.f32.mrb[0].mxu1 }
 0x2a6   : > { %v445_v48 = vmax.f32 %v441_v47, 0.0  ;;  %v682_v49 = vpop.f32.mrb[1].mxu1 }
 0x2a8   : > { %683 = vmatprep.subr.msk.mxu0 %vm453_vm4, %v445_v48 }
 0x2a9   : > { %684 = vmatpush3.msk.msra.mxu0 %vm453_vm4, %v445_v48 }
 0x2aa   : > { %686 = vmatmul.mubr.msk.f32.vlgmr.msra.gmra.mrb[2].mxu0 %vm446_vm3, %v248_v50 }
 0x37d   : > { %v687_v51 = vpop.f32.mrb[2].mxu0 }
 0x37e   : > { %v523_v52 = vpop.f32.mrb[3].mxu0  ;;  %v535_v53 = vsel %vm446_vm3, %v687_v51, 0.0 }
 0x37f   : > { %536 = vadd.xlane.f32.xlu1 %v535_v53  ;;  %v532_v54 = vsel %vm446_vm3, %v523_v52, 0.0 }
 0x380   : > { %533 = vadd.xlane.f32.xlu0 %v532_v54 }
 0x40c   : > { %v537_v55 = vpop.xlane.xlu1 %536 }
 0x40d   : > { %v662_v56 = vmul.f32 -1.442695, %v537_v55  ;;  %v534_v57 = vpop.xlane.xlu0 %533 }
 0x40e   : > { %v661_v58 = vmul.f32 -1.442695, %v534_v57 }
 0x40f   : > { %756 = vpow2.f32 %v662_v56 }
 0x410   : > { %758 = vpow2.f32 %v661_v58 }
 0x419   : > { %v757_v59 = vpop.eup %756 }
 0x41a   : > { %v759_v60 = vpop.eup %758  ;;  %v545_v61 = vadd.f32 1.0, %v757_v59 }
 0x41b   : > { %v544_v62 = vadd.f32 1.0, %v759_v60 }
 0x41c   : > { %760 = vrcp.f32 %v545_v61 }
 0x41d   : > { %762 = vrcp.f32 %v544_v62 }
 0x426   : > { %v761_v63 = vpop.eup %760 }
 0x427   : > { %v763_v0 = vpop.eup %762  ;;  %v552_v1 = vmul.f32 %v761_v63, %v351_v30  ;;  %v553_v2 = vmul.f32 %v761_v63, %v352_v31 }
 0x428   : > { %v550_v3 = vmul.f32 %v763_v0, %v1022_v26  ;;  %v551_v4 = vmul.f32 %v763_v0, %v1024_v27 }
 0x429   : > { %556 = vst [vmem:[%s243_s11 + $0x10] sm:$0xff] %v552_v1  ;;  %557 = vst [vmem:[%s243_s11 + $0x18] sm:$0xff] %v553_v2 }
 0x42a   : > { %554 = vst [vmem:[%s243_s11] sm:$0xff] %v550_v3  ;;  %555 = vst [vmem:[%s243_s11 + $0x8] sm:$0xff] %v551_v4 }
 0x42b   : > { %807 = shalt.err (!%p804_p2)
}
 0x42c   : > { %s808_s30 = scalar_lea.hbm %s1046_s26, 512  ;;  %s812_s29 = scalar_lea.hbm %s1099_s5, 1024 }
 0x42d   : > { %p809_p4 = scmp.ne.s32.totalorder %s1046_s26, %s808_s30  ;;  %p813_p9 = scmp.lt.u32.totalorder %s1046_s26, %s1099_s5 }
 0x42e   : > { %p814_p1 = scmp.lt.u32.totalorder %s812_s29, %s808_s30  ;;  %p816_p6 = scmp.lt.u32.totalorder %s808_s30, %s1046_s26 }
 0x42f   : > { %p810_p5 = pnand %p809_p4, %p1106_p11 }
 0x430   : > { %p815_p3 = por %p814_p1, %p813_p9 }
 0x431   : > { %p811_p7 = pneg %p810_p5 }
 0x432   : > { %p817_p12 = por %p816_p6, %p815_p3 }
 0x434   : > { %p818_p13 = pnand %p817_p12, %p811_p7 }
 0x436   : > { %821 = shalt.err (!%p818_p13)
}
 0x437   : > { %s869_s10 = smov 256   ;;  %s870_s11 = smov 16  }
 0x438   : > { %697 = dma.vmem_to_hbm [thread:$0]  (%p1106_p11), %s1048_s12, 512, %s1046_s26, %s559_s2, %s869_s10, %s869_s10, %s870_s11  }
 0x439 PF: > { %s587_s14 = sand.u32 1, %s848_s20   ;;  %p1107_p8 = scmp.ne.s32.totalorder %s1104_s7, 0 }
 0x43a   : > { %p1108_p10 = scmp.ge.s32.totalorder %s860_s23, 2  ;;  %s588_s24 = scalar_lea.sflag [#allocation5], %s587_s14 }
 0x43c   : > { %p704_p0 = pnand %p1108_p10, %p1107_p8 }
 0x43e   : > { %843 = dma.done.wait (!%p704_p0), %s588_s24, 512  }
 0x43f   : > { %845 = vsyncadd (!%p704_p0), %s588_s24, 4294966784  ;;  %p19_p2 = scmp.ge.s32.totalorder %s929_s25, 4   ;;  %s1109_s20 = smov %s852_s21 }
 0x440   : > { %s1110_s21 = smov %s856_s22  ;;  %s1111_s22 = smov %s941_s28 }
 0x441   : > { %s1112_s23 = smov %s929_s25  ;;  %21 = sbr.rel (!%p19_p2) target bundleno = 7 (0x7), region = 85 }
 0x448   :  { %593 = vsyncpa [#allocation4], 1 }
 0x449   :  { %595 = vsyncpa [#allocation4 + $0x1], 1 }
 0x44a   :  { %596 = vsyncpa [#allocation5], 1 }
 0x44b   :  { %598 = vsyncpa [#allocation5 + $0x1], 1 }

</bundles_post_ra>
